<compile_context>
chip_gen: v7x
topology: tpu7x:2x2x1
jax: 0.10.0
libtpu: 0.0.40
codegen_flags: <defaults>
</compile_context>

<pallas_src>
import jax
import jax.numpy as jnp
from jax.experimental import pallas as pl
from jax.experimental.pallas import tpu as pltpu

# --- deterministic "config" (synthetic, stands in for config.*) -------------
CAR_MAX_SPEED = 10.0
DRIVETRAIN_PARAMS = {
    "car_Tm0": 0.30,
    "car_Tm1": 0.05,
    "car_Tm2": 0.02,
    "car_Tr0": 0.10,
    "car_Tr1": 5.00,
    "car_Tr2": 0.25,
}

LANE_BLOCK = 1024        # lane width of each slab row (8 x 128 lanes, f32)
MAX_TILE_ROWS = 256      # sublane rows per grid step (multiple of 8)
SMALL_N_THRESHOLD = 1 << 16  # below this, plain XLA beats kernel launch cost


def _round_up(v, m):
    return (v + m - 1) // m * m


def _drivetrain_kernel(p_ref, vx_ref, th_ref, o_ref):
    # p_ref : SMEM (6,) pre-scaled params
    #         [Tm0, Tm1/Vmax, Tm2/Vmax, Tr0, Tr1/Vmax, Tr2/Vmax^2]
    # vx_ref, th_ref : VMEM (tile_rows, LANE_BLOCK) f32 channel slabs
    # o_ref          : VMEM (tile_rows, LANE_BLOCK) f32 output slab
    vx = vx_ref[...]
    th = th_ref[...]

    drive = (p_ref[0] + p_ref[1] * vx + p_ref[2] * vx * th) * th
    # jnp.tanh stays on the EUP (separate bundle slot) and overlaps with VALU.
    resist = p_ref[3] * (1.0 - jnp.tanh(p_ref[4] * vx)) + p_ref[5] * vx * vx
    o_ref[...] = drive - resist


def _scaled_params(params):
    scale = jnp.array(
        [1.0,
         1.0 / CAR_MAX_SPEED,
         1.0 / CAR_MAX_SPEED,
         1.0,
         1.0 / CAR_MAX_SPEED,
         1.0 / (CAR_MAX_SPEED * CAR_MAX_SPEED)],
        dtype=jnp.float32)
    return params.astype(jnp.float32) * scale


def drivetrain_forward_planes(vx, throttle, params):
    """Preferred SoA entry point: vx, throttle [N] f32 -> ax [N] f32."""
    n = vx.shape[0]
    # Pad N to a multiple of 8*LANE_BLOCK so rows is always a multiple of 8
    # (<= 32 KiB of padding); the ragged last *block* (if rows % tile_rows != 0)
    # is handled by Pallas pad-and-discard, which is safe for elementwise ops.
    n_pad = _round_up(n, 8 * LANE_BLOCK)
    rows = n_pad // LANE_BLOCK
    tile_rows = min(MAX_TILE_ROWS, rows)
    grid = (pl.cdiv(rows, tile_rows),)
    pad = n_pad - n

    vx_slab = jnp.pad(vx.astype(jnp.float32), (0, pad)).reshape(rows, LANE_BLOCK)
    th_slab = jnp.pad(throttle.astype(jnp.float32), (0, pad)).reshape(rows, LANE_BLOCK)

    out_slab = pl.pallas_call(
        _drivetrain_kernel,
        out_shape=jax.ShapeDtypeStruct((rows, LANE_BLOCK), jnp.float32),
        grid=grid,
        in_specs=[
            pl.BlockSpec(memory_space=pltpu.MemorySpace.SMEM),       # params
            pl.BlockSpec((tile_rows, LANE_BLOCK), lambda i: (i, 0)),  # vx
            pl.BlockSpec((tile_rows, LANE_BLOCK), lambda i: (i, 0)),  # throttle
        ],
        out_specs=pl.BlockSpec((tile_rows, LANE_BLOCK), lambda i: (i, 0)),
        compiler_params=pltpu.CompilerParams(
            # Batch axis is embarrassingly parallel -> megacore split on v7x.
            dimension_semantics=("parallel",),
            # ~6 MiB in flight per step fits every generation's default scoped
            # VMEM, so no explicit vmem_limit_bytes override is needed.
        ),
    )(_scaled_params(params), vx_slab, th_slab)

    ax = out_slab.reshape(n_pad)   # reshape = bitcast, no extra HBM pass
    if pad:
        ax = ax[:n]
    return ax


def _drivetrain_jnp(x, params):
    """Pure-XLA reference / small-N path, exact PyTorch formula."""
    vx = x[:, 0]
    throttle = x[:, 1]
    tm0, tm1, tm2, tr0, tr1, tr2 = [params[i] for i in range(6)]
    vn = vx / CAR_MAX_SPEED
    ax = (tm0 + tm1 * vn + tm2 * vn * throttle) * throttle - (
        tr0 * (1.0 - jnp.tanh(tr1 * vn)) + tr2 * vn * vn
    )
    return ax[:, None]


def drivetrain_forward(x, params, *, force_pallas=False):
    """Torch-compatible entry point: x [N, 2] f32 -> ax [N, 1] f32."""
    n = x.shape[0]
    if n < SMALL_N_THRESHOLD and not force_pallas:
        # Kernel launch + per-step overhead dwarfs the math at small N.
        return _drivetrain_jnp(x, params)
    # The fixed [N, 2] AoS interface forces one upstream channel split; callers
    # that already hold channel-separated data should use
    # drivetrain_forward_planes directly (no extra HBM pass at all).
    ax = drivetrain_forward_planes(x[:, 0], x[:, 1], params)
    return ax.reshape(n, 1)        # (N,) -> (N, 1): bitcast, not a transpose


if __name__ == "__main__":
    key = jax.random.PRNGKey(0)
    k_small, k_big = jax.random.split(key)

    params = jnp.array(
        [
            DRIVETRAIN_PARAMS["car_Tm0"],
            DRIVETRAIN_PARAMS["car_Tm1"],
            DRIVETRAIN_PARAMS["car_Tm2"],
            DRIVETRAIN_PARAMS["car_Tr0"],
            DRIVETRAIN_PARAMS["car_Tr1"],
            DRIVETRAIN_PARAMS["car_Tr2"],
        ],
        dtype=jnp.float32,
    )

    def make_inputs(k, n):
        k_vx, k_th = jax.random.split(k)
        vx = jax.random.uniform(k_vx, (n,), minval=0.0, maxval=CAR_MAX_SPEED)
        th = jax.random.uniform(k_th, (n,), minval=-1.0, maxval=1.0)
        return jnp.stack([vx, th], axis=1).astype(jnp.float32)

    # Small case, forced through the Pallas kernel (single grid step).
    n_small = 8
    x_small = make_inputs(k_small, n_small)
    out_small = jax.block_until_ready(
        drivetrain_forward(x_small, params, force_pallas=True))
    ref_small = _drivetrain_jnp(x_small, params)
    assert out_small.shape == (n_small, 1), out_small.shape
    assert jnp.allclose(out_small, ref_small, atol=1e-5, rtol=1e-5)

    # Larger case: multi-step grid, ragged last block, padding strip.
    n_big = 300_000
    x_big = make_inputs(k_big, n_big)
    out_big = jax.block_until_ready(drivetrain_forward(x_big, params))
    ref_big = _drivetrain_jnp(x_big, params)
    assert out_big.shape == (n_big, 1), out_big.shape
    assert jnp.allclose(out_big, ref_big, atol=1e-5, rtol=1e-5)

    print("KERNEL_OK")
</pallas_src>

<mosaic_0001>
module attributes {stable_mosaic.version = 11 : i64} {
  func.func @_drivetrain_kernel(%arg0: i32, %arg1: memref<6xf32, #tpu.memory_space<smem>>, %arg2: memref<8x1024xf32, #tpu.memory_space<vmem>>, %arg3: memref<8x1024xf32, #tpu.memory_space<vmem>>, %arg4: memref<8x1024xf32, #tpu.memory_space<vmem>>) attributes {dimension_semantics = [#tpu.dimension_semantics<parallel>], iteration_bounds = array<i64: 1>, scalar_prefetch = 0 : i64, scratch_operands = 0 : i64, tpu.core_type = #tpu.core_type<tc>, window_params = [{transform_indices = @transform_0, window_bounds = array<i64: 6>}, {transform_indices = @transform_1, window_bounds = array<i64: 8, 1024>}, {transform_indices = @transform_2, window_bounds = array<i64: 8, 1024>}, {transform_indices = @transform_3, window_bounds = array<i64: 8, 1024>}]} {
    %c0 = arith.constant 0 : index
    %c0_0 = arith.constant 0 : index
    %0 = vector.load %arg2[%c0, %c0_0] : memref<8x1024xf32, #tpu.memory_space<vmem>>, vector<8x1024xf32>
    %c0_1 = arith.constant 0 : index
    %c0_2 = arith.constant 0 : index
    %1 = vector.load %arg3[%c0_1, %c0_2] : memref<8x1024xf32, #tpu.memory_space<vmem>>, vector<8x1024xf32>
    %c0_3 = arith.constant 0 : index
    %2 = memref.load %arg1[%c0_3] : memref<6xf32, #tpu.memory_space<smem>>
    %c1 = arith.constant 1 : index
    %3 = memref.load %arg1[%c1] : memref<6xf32, #tpu.memory_space<smem>>
    %4 = vector.broadcast %3 : f32 to vector<8x1024xf32>
    %5 = arith.mulf %4, %0 : vector<8x1024xf32>
    %6 = vector.broadcast %2 : f32 to vector<8x1024xf32>
    %7 = arith.addf %6, %5 : vector<8x1024xf32>
    %c2 = arith.constant 2 : index
    %8 = memref.load %arg1[%c2] : memref<6xf32, #tpu.memory_space<smem>>
    %9 = vector.broadcast %8 : f32 to vector<8x1024xf32>
    %10 = arith.mulf %9, %0 : vector<8x1024xf32>
    %11 = arith.mulf %10, %1 : vector<8x1024xf32>
    %12 = arith.addf %7, %11 : vector<8x1024xf32>
    %13 = arith.mulf %12, %1 : vector<8x1024xf32>
    %c3 = arith.constant 3 : index
    %14 = memref.load %arg1[%c3] : memref<6xf32, #tpu.memory_space<smem>>
    %c4 = arith.constant 4 : index
    %15 = memref.load %arg1[%c4] : memref<6xf32, #tpu.memory_space<smem>>
    %16 = vector.broadcast %15 : f32 to vector<8x1024xf32>
    %17 = arith.mulf %16, %0 : vector<8x1024xf32>
    %18 = math.tanh %17 : vector<8x1024xf32>
    %cst = arith.constant 1.000000e+00 : f32
    %19 = vector.broadcast %cst : f32 to vector<8x1024xf32>
    %20 = arith.subf %19, %18 : vector<8x1024xf32>
    %21 = vector.broadcast %14 : f32 to vector<8x1024xf32>
    %22 = arith.mulf %21, %20 : vector<8x1024xf32>
    %c5 = arith.constant 5 : index
    %23 = memref.load %arg1[%c5] : memref<6xf32, #tpu.memory_space<smem>>
    %24 = vector.broadcast %23 : f32 to vector<8x1024xf32>
    %25 = arith.mulf %24, %0 : vector<8x1024xf32>
    %26 = arith.mulf %25, %0 : vector<8x1024xf32>
    %27 = arith.addf %22, %26 : vector<8x1024xf32>
    %28 = arith.subf %13, %27 : vector<8x1024xf32>
    %c0_4 = arith.constant 0 : index
    %c0_5 = arith.constant 0 : index
    %29 = vector.load %arg4[%c0_4, %c0_5] : memref<8x1024xf32, #tpu.memory_space<vmem>>, vector<8x1024xf32>
    tpu.vector_store %arg4[%c0_4, %c0_5], %28 {strides = array<i32>} : memref<8x1024xf32, #tpu.memory_space<vmem>>, vector<8x1024xf32>,
    return
  }
  func.func @transform_0(%arg0: i32) -> i32 {
    %c0_i32 = arith.constant 0 : i32
    %c0_i32_0 = arith.constant 0 : i32
    return %c0_i32 : i32
  }
  func.func @transform_1(%arg0: i32) -> (i32, i32) {
    %c0_i32 = arith.constant 0 : i32
    %c0_i32_0 = arith.constant 0 : i32
    return %arg0, %c0_i32 : i32, i32
  }
  func.func @transform_2(%arg0: i32) -> (i32, i32) {
    %c0_i32 = arith.constant 0 : i32
    %c0_i32_0 = arith.constant 0 : i32
    return %arg0, %c0_i32 : i32, i32
  }
  func.func @transform_3(%arg0: i32) -> (i32, i32) {
    %c0_i32 = arith.constant 0 : i32
    %c0_i32_0 = arith.constant 0 : i32
    return %arg0, %c0_i32 : i32, i32
  }
}

</mosaic_0001>

<bundles_post_ra>
// kernel: tpu_custom_call.1
= control target key start
LH: loop header
LB: loop body
LE: loop exit
PB: predicated region body
PF: predicated region fallthrough
CT: control target
= control target key end

     0   :  { %8 = vsyncpa [#allocation5], 0  ;;  %s480_s0 = inlined_call_operand.hbm [shape: f32[6], index: 0, kind: input, shape index: {}]   ;;  %s481_s1 = inlined_call_operand.hbm [shape: f32[8,1024], index: 1, kind: input, shape index: {}]   ;;  %s482_s2 = inlined_call_operand.hbm [shape: f32[8,1024], index: 2, kind: input, shape index: {}]   ;;  %s483_s3 = inlined_call_operand.hbm [shape: f32[8,1024], index: 3, kind: output, shape index: {}]  }
   0x1   :  { %9 = vsyncpa [#allocation3], 0 }
   0x2   :  { %10 = vsyncpa [#allocation8], 0 }
   0x3   :  { %11 = vsyncpa [#allocation4], 0  ;;  %s240_s14 = scalar_lea.hbm %s480_s0, 16 }
   0x4   :  { %p241_p0 = scmp.ne.s32.totalorder %s480_s0, %s240_s14  ;;  %p244_p1 = scmp.lt.u32.totalorder %s240_s14, %s480_s0 }
   0x6   :  { %p246_p2 = pnand %p244_p1, %p241_p0 }
   0x8   :  { %249 = shalt.err (!%p246_p2)
}
   0x9   :  { %s324_s19 = smov [#allocation2]   ;;  %s325_s22 = smov [#allocation6]  }
   0xa   :  { %19 = dma.hbm_to_smem %s480_s0, 16, %s324_s19, [#allocation5]  }
   0xb   :  { %s26_s23 = sshll.u32 %s325_s22, 4  ;;  %s326_s24 = smov [#allocation7]   ;;  %s27_s23 = int_to_ptr.vmem [resolvable:$true] %s26_s23 }
   0xc   :  { %s36_s25 = sshll.u32 %s326_s24, 4  ;;  %s250_s28 = scalar_lea.hbm %s481_s1, 1024  ;;  %s37_s25 = int_to_ptr.vmem [resolvable:$true] %s36_s25 }
   0xd   :  { %p251_p3 = scmp.ne.s32.totalorder %s481_s1, %s250_s28  ;;  %p254_p4 = scmp.lt.u32.totalorder %s250_s28, %s481_s1 }
   0xf   :  { %p256_p5 = pnand %p254_p4, %p251_p3 }
  0x11   :  { %259 = shalt.err (!%p256_p5)
}
  0x12   :  { %s260_s0 = scalar_lea.vmem %s27_s23, 1024  ;;  %p265_p7 = scmp.lt.s32.totalorder %s27_s23, %s27_s23 }
  0x13   :  { %p261_p6 = scmp.ne.s32.totalorder %s27_s23, %s260_s0  ;;  %p266_p8 = scmp.lt.s32.totalorder %s260_s0, %s260_s0 }
  0x15   :  { %p267_p9 = por %p266_p8, %p265_p7 }
  0x17   :  { %p268_p10 = pnand %p267_p9, %p261_p6 }
  0x19   :  { %271 = shalt.err (!%p268_p10)
}
  0x1a   :  { %29 = dma.hbm_to_vmem [thread:$0]  %s481_s1, 1024, %s27_s23, [#allocation3]  }
  0x1b   :  { %s272_s10 = scalar_lea.hbm %s482_s2, 1024 }
  0x1c   :  { %p273_p11 = scmp.ne.s32.totalorder %s482_s2, %s272_s10  ;;  %p276_p12 = scmp.lt.u32.totalorder %s272_s10, %s482_s2 }
  0x1e   :  { %p278_p13 = pnand %p276_p12, %p273_p11 }
  0x20   :  { %281 = shalt.err (!%p278_p13)
}
  0x21   :  { %s282_s15 = scalar_lea.vmem %s37_s25, 1024  ;;  %p287_p1 = scmp.lt.s32.totalorder %s37_s25, %s37_s25 }
  0x22   :  { %p283_p0 = scmp.ne.s32.totalorder %s37_s25, %s282_s15  ;;  %p288_p2 = scmp.lt.s32.totalorder %s282_s15, %s282_s15 }
  0x24   :  { %p289_p3 = por %p288_p2, %p287_p1 }
  0x26   :  { %p290_p4 = pnand %p289_p3, %p283_p0 }
  0x28   :  { %293 = shalt.err (!%p290_p4)
}
  0x29   :  { %39 = dma.hbm_to_vmem [thread:$0]  %s482_s2, 1024, %s37_s25, [#allocation8]  }
  0x2a   :  { %316 = dma.done.wait [#allocation5], 16  }
  0x2b   :  { %317 = vsyncadd [#allocation5], 4294967280 }
  0x2c   :  { %318 = dma.done.wait [#allocation3], 1024  }
  0x2d   :  { %319 = vsyncadd [#allocation3], 4294966272 }
  0x2e   :  { %320 = dma.done.wait [#allocation8], 1024  }
  0x2f   :  { %321 = vsyncadd [#allocation8], 4294966272 }
  0x30   :  { %49 = sfence }
  0x31   :  { %s215_s17 = sld [smem:[#allocation2 + $0x1]]  ;;  %s216_s18 = sld [smem:[#allocation2 + $0x2]]  ;;  %v50_v0 = vld [vmem:[#allocation6] sm:$0xff]  ;;  %v51_v3 = vld [vmem:[#allocation6 + $0x8] sm:$0xff]  ;;  %v52_v11 = vld [vmem:[#allocation6 + $0x10] sm:$0xff] }
  0x32   :  { %s218_s19 = sld [smem:[#allocation2 + $0x4]]  ;;  %s66_s20 = sld [smem:[#allocation2]]  ;;  %v58_v12 = vld [vmem:[#allocation7] sm:$0xff]  ;;  %v59_v14 = vld [vmem:[#allocation7 + $0x8] sm:$0xff]  ;;  %v53_v17 = vld [vmem:[#allocation6 + $0x18] sm:$0xff] }
  0x33   :  { %s219_s21 = sld [smem:[#allocation2 + $0x5]]  ;;  %s393_s2 = sld [smem:[#allocation2 + $0x3]]  ;;  %v60_v19 = vld [vmem:[#allocation7 + $0x10] sm:$0xff]  ;;  %v407_v25 = vld [vmem:[#allocation6 + $0x20] sm:$0xff]  ;;  %v61_v33 = vld [vmem:[#allocation7 + $0x18] sm:$0xff] }
  0x34   :  { %v421_v37 = vld [vmem:[#allocation6 + $0x28] sm:$0xff]  ;;  %v62_v41 = vld [vmem:[#allocation7 + $0x20] sm:$0xff]  ;;  %v434_v54 = vld [vmem:[#allocation6 + $0x30] sm:$0xff]  ;;  %s327_s22 = smov [#allocation9]  }
  0x35   :  { %v63_v63 = vld [vmem:[#allocation7 + $0x28] sm:$0xff]  ;;  %s204_s23 = sshll.u32 %s327_s22, 4  ;;  %s205_s23 = int_to_ptr.vmem [resolvable:$true] %s204_s23 }
  0x36   :  { %s294_s24 = scalar_lea.vmem %s205_s23, 1024  ;;  %p299_p6 = scmp.lt.s32.totalorder %s205_s23, %s205_s23 }
  0x37   :  { %v384_v1 = vstv %s215_s17  ;;  %v386_v2 = vstv %s216_s18  ;;  %p295_p5 = scmp.ne.s32.totalorder %s205_s23, %s294_s24  ;;  %p300_p7 = scmp.lt.s32.totalorder %s294_s24, %s294_s24 }
  0x38   :  { %v388_v4 = vstv %s218_s19  ;;  %v69_v5 = vmul.f32 %v384_v1, %v50_v0  ;;  %v88_v7 = vmul.f32 %v386_v2, %v50_v0  ;;  %v70_v8 = vmul.f32 %v384_v1, %v51_v3 }
  0x39   :  { %v123_v6 = vmul.f32 %v388_v4, %v50_v0  ;;  %v89_v9 = vmul.f32 %v386_v2, %v51_v3  ;;  %v124_v10 = vmul.f32 %v388_v4, %v51_v3  ;;  %v398_v13 = vstv %s66_s20  ;;  %p301_p8 = por %p300_p7, %p299_p6 }
  0x3a   :  { %v71_v15 = vmul.f32 %v384_v1, %v52_v11  ;;  %v90_v16 = vmul.f32 %v386_v2, %v52_v11  ;;  %v402_v18 = vstv %s219_s21  ;;  %v125_v20 = vmul.f32 %v388_v4, %v52_v11 }
  0x3b   :  { %224 = vtanh.f32 %v123_v6  ;;  %v78_v21 = vadd.f32 %v398_v13, %v69_v5  ;;  %v96_v22 = vmul.f32 %v88_v7, %v58_v12  ;;  %v79_v23 = vadd.f32 %v398_v13, %v70_v8  ;;  %p302_p9 = pnand %p301_p8, %p295_p5 }
  0x3c   :  { %226 = vtanh.f32 %v124_v10  ;;  %v97_v24 = vmul.f32 %v89_v9, %v59_v14  ;;  %v72_v26 = vmul.f32 %v384_v1, %v53_v17  ;;  %v91_v27 = vmul.f32 %v386_v2, %v53_v17 }
  0x3d   :  { %228 = vtanh.f32 %v125_v20  ;;  %v126_v28 = vmul.f32 %v388_v4, %v53_v17  ;;  %v158_v29 = vmul.f32 %v402_v18, %v50_v0  ;;  %v159_v30 = vmul.f32 %v402_v18, %v51_v3 }
  0x3e   :  { %v80_v31 = vadd.f32 %v398_v13, %v71_v15  ;;  %v98_v32 = vmul.f32 %v90_v16, %v60_v19  ;;  %v73_v34 = vmul.f32 %v384_v1, %v407_v25  ;;  %v92_v35 = vmul.f32 %v386_v2, %v407_v25  ;;  %v57_v16 = vld [vmem:[#allocation6 + $0x38] sm:$0xff] }
  0x3f   :  { %230 = vtanh.f32 %v126_v28  ;;  %v127_v36 = vmul.f32 %v388_v4, %v407_v25  ;;  %v104_v38 = vadd.f32 %v96_v22, %v78_v21  ;;  %v424_v39 = vstv %s393_s2  ;;  %v64_v28 = vld [vmem:[#allocation7 + $0x30] sm:$0xff] }
  0x40   :  { %v105_v40 = vadd.f32 %v97_v24, %v79_v23  ;;  %v160_v42 = vmul.f32 %v402_v18, %v52_v11  ;;  %v81_v43 = vadd.f32 %v398_v13, %v72_v26  ;;  %v99_v44 = vmul.f32 %v91_v27, %v61_v33 }
  0x41   :  { %232 = vtanh.f32 %v127_v36  ;;  %v166_v45 = vmul.f32 %v158_v29, %v50_v0  ;;  %v167_v46 = vmul.f32 %v159_v30, %v51_v3  ;;  %v106_v47 = vadd.f32 %v98_v32, %v80_v31 }
  0x42   :  { %v128_v48 = vmul.f32 %v388_v4, %v421_v37  ;;  %v161_v50 = vmul.f32 %v402_v18, %v53_v17  ;;  %v82_v51 = vadd.f32 %v398_v13, %v73_v34  ;;  %v100_v52 = vmul.f32 %v92_v35, %v62_v41 }
  0x43   :  { %v74_v53 = vmul.f32 %v384_v1, %v421_v37  ;;  %v112_v56 = vmul.f32 %v104_v38, %v58_v12  ;;  %v93_v58 = vmul.f32 %v386_v2, %v421_v37  ;;  %v113_v59 = vmul.f32 %v105_v40, %v59_v14 }
  0x44   :  { %234 = vtanh.f32 %v128_v48  ;;  %v168_v61 = vmul.f32 %v160_v42, %v52_v11  ;;  %v107_v62 = vadd.f32 %v99_v44, %v81_v43  ;;  %v114_v3 = vmul.f32 %v106_v47, %v60_v19 }
  0x45   :  { %v225_v49 = vpop.eup %224  ;;  %v162_v5 = vmul.f32 %v402_v18, %v407_v25  ;;  %v129_v6 = vmul.f32 %v388_v4, %v434_v54  ;;  %v169_v9 = vmul.f32 %v161_v50, %v53_v17  ;;  %v108_v10 = vadd.f32 %v100_v52, %v82_v51 }
  0x46   :  { %v227_v55 = vpop.eup %226  ;;  %v139_v57 = vsub.f32 1.0, %v225_v49  ;;  %v83_v12 = vadd.f32 %v398_v13, %v74_v53  ;;  %v101_v15 = vmul.f32 %v93_v58, %v63_v63  ;;  %v115_v21 = vmul.f32 %v107_v62, %v61_v33  ;;  %v65_v49 = vld [vmem:[#allocation7 + $0x38] sm:$0xff] }
  0x47   :  { %v140_v60 = vsub.f32 1.0, %v227_v55  ;;  %v229_v7 = vpop.eup %228  ;;  %236 = vtanh.f32 %v129_v6  ;;  %v75_v22 = vmul.f32 %v384_v1, %v434_v54  ;;  %v94_v23 = vmul.f32 %v386_v2, %v434_v54 }
  0x48   :  { %v148_v0 = vmul.f32 %v424_v39, %v139_v57  ;;  %v141_v11 = vsub.f32 1.0, %v229_v7  ;;  %v170_v27 = vmul.f32 %v162_v5, %v407_v25  ;;  %v116_v31 = vmul.f32 %v108_v10, %v62_v41 }
  0x49   :  { %v149_v8 = vmul.f32 %v424_v39, %v140_v60  ;;  %v231_v20 = vpop.eup %230  ;;  %v163_v32 = vmul.f32 %v402_v18, %v421_v37  ;;  %v130_v33 = vmul.f32 %v388_v4, %v57_v16  ;;  %v109_v38 = vadd.f32 %v101_v15, %v83_v12 }
  0x4a   :  { %v174_v14 = vadd.f32 %v166_v45, %v148_v0  ;;  %v150_v17 = vmul.f32 %v424_v39, %v141_v11  ;;  %v142_v26 = vsub.f32 1.0, %v231_v20  ;;  %v84_v40 = vadd.f32 %v398_v13, %v75_v22 }
  0x4b   :  { %v175_v19 = vadd.f32 %v167_v46, %v149_v8  ;;  %v233_v29 = vpop.eup %232  ;;  %v102_v42 = vmul.f32 %v94_v23, %v64_v28  ;;  %v76_v25 = vmul.f32 %v384_v1, %v57_v16  ;;  %238 = vtanh.f32 %v130_v33 }
  0x4c   :  { %v182_v24 = vsub.f32 %v112_v56, %v174_v14  ;;  %v176_v34 = vadd.f32 %v168_v61, %v150_v17  ;;  %v151_v35 = vmul.f32 %v424_v39, %v142_v26  ;;  %v143_v36 = vsub.f32 1.0, %v233_v29 }
  0x4d   :  { %v183_v30 = vsub.f32 %v113_v59, %v175_v19  ;;  %v95_v4 = vmul.f32 %v386_v2, %v57_v16  ;;  %v171_v47 = vmul.f32 %v163_v32, %v421_v37  ;;  %v164_v48 = vmul.f32 %v402_v18, %v434_v54 }
  0x4e   :  { %190 = vst [vmem:[#allocation9] sm:$0xff] %v182_v24  ;;  %v235_v43 = vpop.eup %234  ;;  %v184_v41 = vsub.f32 %v114_v3, %v176_v34  ;;  %v177_v44 = vadd.f32 %v169_v9, %v151_v35  ;;  %v152_v45 = vmul.f32 %v424_v39, %v143_v36  ;;  %v117_v52 = vmul.f32 %v109_v38, %v63_v63 }
  0x4f   :  { %191 = vst [vmem:[#allocation9 + $0x8] sm:$0xff] %v183_v30  ;;  %v144_v46 = vsub.f32 1.0, %v235_v43  ;;  %v110_v53 = vadd.f32 %v102_v42, %v84_v40  ;;  %v85_v57 = vadd.f32 %v398_v13, %v76_v25  ;;  %v103_v2 = vmul.f32 %v95_v4, %v65_v49 }
  0x50   :  { %192 = vst [vmem:[#allocation9 + $0x10] sm:$0xff] %v184_v41  ;;  %v185_v50 = vsub.f32 %v115_v21, %v177_v44  ;;  %v178_v51 = vadd.f32 %v170_v27, %v152_v45  ;;  %v172_v37 = vmul.f32 %v164_v48, %v434_v54  ;;  %v165_v60 = vmul.f32 %v402_v18, %v57_v16 }
  0x51   :  { %v153_v1 = vmul.f32 %v424_v39, %v144_v46  ;;  %v237_v55 = vpop.eup %236  ;;  %v118_v62 = vmul.f32 %v110_v53, %v64_v28  ;;  %v111_v0 = vadd.f32 %v103_v2, %v85_v57 }
  0x52   :  { %193 = vst [vmem:[#allocation9 + $0x18] sm:$0xff] %v185_v50  ;;  %v186_v56 = vsub.f32 %v116_v31, %v178_v51  ;;  %v145_v59 = vsub.f32 1.0, %v237_v55  ;;  %v173_v7 = vmul.f32 %v165_v60, %v57_v16 }
  0x53   :  { %v179_v58 = vadd.f32 %v171_v47, %v153_v1  ;;  %v119_v13 = vmul.f32 %v111_v0, %v65_v49 }
  0x54   :  { %194 = vst [vmem:[#allocation9 + $0x20] sm:$0xff] %v186_v56  ;;  %v154_v63 = vmul.f32 %v424_v39, %v145_v59 }
  0x55   :  { %v187_v61 = vsub.f32 %v117_v52, %v179_v58  ;;  %v239_v3 = vpop.eup %238 }
  0x56   :  { %v180_v5 = vadd.f32 %v172_v37, %v154_v63  ;;  %v146_v6 = vsub.f32 1.0, %v239_v3 }
  0x57   :  { %195 = vst [vmem:[#allocation9 + $0x28] sm:$0xff] %v187_v61 }
  0x58   :  { %v188_v8 = vsub.f32 %v118_v62, %v180_v5  ;;  %v155_v9 = vmul.f32 %v424_v39, %v146_v6 }
  0x5a   :  { %196 = vst [vmem:[#allocation9 + $0x30] sm:$0xff] %v188_v8  ;;  %v181_v54 = vadd.f32 %v173_v7, %v155_v9 }
  0x5c   :  { %v189_v10 = vsub.f32 %v119_v13, %v181_v54 }
  0x5e   :  { %197 = vst [vmem:[#allocation9 + $0x38] sm:$0xff] %v189_v10 }
  0x5f   :  { %305 = shalt.err (!%p302_p9)
}
  0x60   :  { %s306_s27 = scalar_lea.hbm %s483_s3, 1024 }
  0x61   :  { %p307_p10 = scmp.ne.s32.totalorder %s483_s3, %s306_s27  ;;  %p310_p11 = scmp.lt.u32.totalorder %s306_s27, %s483_s3 }
  0x63   :  { %p312_p12 = pnand %p310_p11, %p307_p10 }
  0x65   :  { %315 = shalt.err (!%p312_p12)
}
  0x66   :  { %207 = dma.vmem_to_hbm [thread:$0]  %s205_s23, 1024, %s483_s3, [#allocation4]  }
  0x67   :  { %322 = dma.done.wait [#allocation4], 1024  }
  0x68   :  { %323 = vsyncadd [#allocation4], 4294966272 }
  0x69   :  { %211 = vsyncpa [#allocation3], 1 }
  0x6a   :  { %212 = vsyncpa [#allocation8], 1 }
  0x6b   :  { %213 = vsyncpa [#allocation4], 1 }
  0x6c   :  { %214 = vsyncpa [#allocation5], 1 }

</bundles_post_ra>
